<compile_context>
chip_gen: v7x
topology: tpu7x:2x2x1
jax: 0.10.0
libtpu: 0.0.40
codegen_flags: <defaults>
</compile_context>

<pallas_src>
import functools

import jax
import jax.numpy as jnp
from jax.experimental import pallas as pl
from jax.experimental.pallas import tpu as pltpu

_EPS = 1e-5  # GroupNorm default eps


def _cab_kernel(x_ref, w1t_ref, w2t_ref, p1_ref, p2_ref, o_ref,
                sum_acc, max_acc, *, hw_total, t_hw, need_mask):
    """One grid step: a (TB, C, T_HW) slab of the input.

    Grid: (batch_tiles, hw_tiles).  The hw axis is a running reduction held in
    the (TB, C) scratch accumulators; the FC/GN/PReLU/sigmoid epilogue runs on
    the last hw step only.
    """
    k = pl.program_id(1)
    n_k = pl.num_programs(1)

    @pl.when(k == 0)
    def _init():
        sum_acc[...] = jnp.zeros_like(sum_acc)
        max_acc[...] = jnp.full_like(max_acc, -jnp.inf)

    # Load the block and cast to f32 in-register (activation stays bf16/f32 on
    # the wire; the cast is free VPU filler under the DMA).
    x = x_ref[...].astype(jnp.float32)                 # (TB, C, T_HW)

    def _acc_full():
        sum_acc[...] += jnp.sum(x, axis=-1)            # (TB, C)
        max_acc[...] = jnp.maximum(max_acc[...], jnp.max(x, axis=-1))

    if need_mask:
        is_last = k == n_k - 1

        @pl.when(jnp.logical_not(is_last))
        def _acc_unmasked():
            _acc_full()

        @pl.when(is_last)
        def _acc_masked():
            # Only the ragged final tile pays for the iota + masking.
            lane = jax.lax.broadcasted_iota(jnp.int32, x.shape, 2)
            valid = (k * t_hw + lane) < hw_total
            sum_acc[...] += jnp.sum(jnp.where(valid, x, 0.0), axis=-1)
            max_acc[...] = jnp.maximum(
                max_acc[...],
                jnp.max(jnp.where(valid, x, -jnp.inf), axis=-1))
    else:
        _acc_full()

    @pl.when(k == n_k - 1)
    def _finalize():
        inv_hw = jnp.float32(1.0 / hw_total)           # divide by TRUE HW
        avg = sum_acc[...] * inv_hw                    # (TB, C)
        mx = max_acc[...]                              # (TB, C)
        tb = avg.shape[0]

        # Fused branches: rows 0..TB-1 = avg pool, rows TB..2TB-1 = max pool.
        pooled = jnp.concatenate([avg, mx], axis=0)    # (2*TB, C)

        w1t = w1t_ref[...]                             # (C, Cr)  == fc1.weight.T
        w2t = w2t_ref[...]                             # (Cr, C)  == fc2.weight.T
        p1 = p1_ref[...]                               # (3, Cr): [prelu_a, gn1_g, gn1_b]
        p2 = p2_ref[...]                               # (2, C):  [gn2_g, gn2_b]

        # fc1 (1x1 conv on a (C,1,1) tensor == channel matmul)
        h = jnp.dot(pooled, w1t, preferred_element_type=jnp.float32)   # (2TB, Cr)
        # GroupNorm(num_groups=1) over the Cr channels, per sample (biased var)
        mu = jnp.mean(h, axis=-1, keepdims=True)
        var = jnp.mean((h - mu) * (h - mu), axis=-1, keepdims=True)
        h = (h - mu) * jax.lax.rsqrt(var + _EPS)
        h = h * p1[1:2, :] + p1[2:3, :]
        # PReLU with per-channel slope
        h = jnp.where(h >= 0.0, h, p1[0:1, :] * h)

        # fc2
        y = jnp.dot(h, w2t, preferred_element_type=jnp.float32)        # (2TB, C)
        # GroupNorm(num_groups=1) over the C channels
        mu2 = jnp.mean(y, axis=-1, keepdims=True)
        var2 = jnp.mean((y - mu2) * (y - mu2), axis=-1, keepdims=True)
        y = (y - mu2) * jax.lax.rsqrt(var2 + _EPS)
        y = y * p2[0:1, :] + p2[1:2, :]

        # sigmoid(avg_branch + max_branch) -> lane-dense (TB, C) output
        o_ref[...] = jax.nn.sigmoid(y[:tb] + y[tb:2 * tb])


def _round_down_mult(x, m):
    return (x // m) * m


def _pick_tiles(B, C, HW, itemsize, x_budget=8 << 20):
    """Pick (TB, T_HW) jointly so the (TB, C, T_HW) block fits `x_budget`.

    TB must be a valid second-to-last block dim for the (B, C) output:
    TB == B or TB a multiple of 8 (and a divisor of B).  T_HW must be a
    multiple of 128 or the full HW.
    """
    cands = sorted(d for d in range(1, B + 1)
                   if B % d == 0 and (d == B or d % 8 == 0))
    tb_min = cands[0]

    if tb_min * C * HW * itemsize <= x_budget or HW <= 128:
        t_hw = HW
    else:
        t_hw = _round_down_mult(x_budget // (tb_min * C * itemsize), 128)
        t_hw = max(128, min(t_hw, max(128, _round_down_mult(HW, 128))))

    per_block = C * t_hw * itemsize
    fitting = [d for d in cands if d * per_block <= x_budget]
    tb = max(fitting) if fitting else tb_min
    return tb, t_hw


@functools.partial(jax.jit, static_argnames=("hw_tile",))
def cab_forward(x_nchw, w1, w2, prelu_a, gn1_g, gn1_b, gn2_g, gn2_b, *,
                hw_tile=None):
    B, C, H, W = x_nchw.shape
    Cr = w1.shape[0]
    HW = H * W

    # No dtype up-cast here: stream the activation in its native dtype.
    x = x_nchw.reshape(B, C, HW)
    itemsize = x.dtype.itemsize

    tb, t_hw = _pick_tiles(B, C, HW, itemsize)
    if hw_tile is not None:
        t_hw = min(int(hw_tile), HW)
        assert t_hw == HW or t_hw % 128 == 0, "hw_tile must be *128 or full HW"
        tb, _ = _pick_tiles(B, C, t_hw, itemsize)

    n_b = B // tb
    n_k = pl.cdiv(HW, t_hw)
    need_mask = (HW % t_hw) != 0

    # Packed small parameters (f32): two arrays instead of five (K,) streams.
    w1t = jnp.transpose(w1).astype(jnp.float32)                          # (C, Cr)
    w2t = jnp.transpose(w2).astype(jnp.float32)                          # (Cr, C)
    p1 = jnp.stack([prelu_a, gn1_g, gn1_b], axis=0).astype(jnp.float32)  # (3, Cr)
    p2 = jnp.stack([gn2_g, gn2_b], axis=0).astype(jnp.float32)           # (2, C)

    block_bytes = tb * C * t_hw * itemsize
    vmem_limit = int(min(64 << 20, max(16 << 20, 4 * block_bytes + (4 << 20))))

    cost = pl.CostEstimate(
        flops=int(2 * B * C * HW + 8 * B * C * Cr),     # reductions + fused matmuls
        transcendentals=int(B * C + 8 * B),             # sigmoid + rsqrts
        bytes_accessed=int(B * C * HW * itemsize + B * C * 4
                           + (w1t.size + w2t.size + p1.size + p2.size) * 4),
    )

    kernel = functools.partial(_cab_kernel, hw_total=HW, t_hw=t_hw,
                               need_mask=need_mask)

    out = pl.pallas_call(
        kernel,
        out_shape=jax.ShapeDtypeStruct((B, C), jnp.float32),
        grid_spec=pltpu.PrefetchScalarGridSpec(
            num_scalar_prefetch=0,
            grid=(n_b, n_k),
            in_specs=[
                pl.BlockSpec((tb, C, t_hw), lambda b, k: (b, 0, k)),   # x
                pl.BlockSpec((C, Cr), lambda b, k: (0, 0)),            # w1.T
                pl.BlockSpec((Cr, C), lambda b, k: (0, 0)),            # w2.T
                pl.BlockSpec((3, Cr), lambda b, k: (0, 0)),            # prelu/gn1
                pl.BlockSpec((2, C), lambda b, k: (0, 0)),             # gn2
            ],
            out_specs=pl.BlockSpec((tb, C), lambda b, k: (b, 0)),
            scratch_shapes=[
                pltpu.VMEM((tb, C), jnp.float32),   # running sum
                pltpu.VMEM((tb, C), jnp.float32),   # running max
            ],
        ),
        compiler_params=pltpu.CompilerParams(
            dimension_semantics=("parallel", "arbitrary"),
            vmem_limit_bytes=vmem_limit),
        cost_estimate=cost,
    )(x, w1t, w2t, p1, p2)

    return out.reshape(B, C, 1, 1)


def cab_reference(x, w1, w2, prelu_a, gn1_g, gn1_b, gn2_g, gn2_b):
    """Pure-JAX reference implementing the PyTorch forward exactly (f32)."""
    x = x.astype(jnp.float32)
    B, C, H, W = x.shape
    Cr = w1.shape[0]

    def gn(v, gamma, beta):                        # v: (B, K, 1, 1), groups=1
        mu = jnp.mean(v, axis=(1, 2, 3), keepdims=True)
        var = jnp.mean((v - mu) ** 2, axis=(1, 2, 3), keepdims=True)
        vn = (v - mu) / jnp.sqrt(var + _EPS)
        return vn * gamma.reshape(1, -1, 1, 1) + beta.reshape(1, -1, 1, 1)

    def branch(p):                                 # p: (B, C, 1, 1)
        h = jnp.einsum('rc,bcxy->brxy', w1, p)
        h = gn(h, gn1_g, gn1_b)
        h = jnp.where(h >= 0, h, prelu_a.reshape(1, Cr, 1, 1) * h)
        y = jnp.einsum('cr,brxy->bcxy', w2, h)
        return gn(y, gn2_g, gn2_b)

    avg_p = jnp.mean(x, axis=(2, 3), keepdims=True)
    max_p = jnp.max(x, axis=(2, 3), keepdims=True)
    return jax.nn.sigmoid(branch(avg_p) + branch(max_p))


if __name__ == "__main__":
    # Small shapes consistent with the module: in_planes=16, ratio=4.
    B, C, H, W = 2, 16, 16, 16
    ratio = 4
    Cr = C // ratio

    key = jax.random.PRNGKey(0)
    k_x, k_w1, k_w2, k_x2 = jax.random.split(key, 4)

    x = jax.random.normal(k_x, (B, C, H, W), dtype=jnp.float32)

    # Deterministic parameter init (PyTorch defaults where meaningful).
    w1 = 0.1 * jax.random.normal(k_w1, (Cr, C), dtype=jnp.float32)   # fc1 1x1 conv
    w2 = 0.1 * jax.random.normal(k_w2, (C, Cr), dtype=jnp.float32)   # fc2 1x1 conv
    prelu_a = jnp.full((Cr,), 0.25, dtype=jnp.float32)
    gn1_g = jnp.ones((Cr,), dtype=jnp.float32)
    gn1_b = jnp.zeros((Cr,), dtype=jnp.float32)
    gn2_g = jnp.ones((C,), dtype=jnp.float32)
    gn2_b = jnp.zeros((C,), dtype=jnp.float32)

    # 1) f32 input, single HW tile (fast path).
    out = jax.block_until_ready(
        cab_forward(x, w1, w2, prelu_a, gn1_g, gn1_b, gn2_g, gn2_b))
    ref = cab_reference(x, w1, w2, prelu_a, gn1_g, gn1_b, gn2_g, gn2_b)
    assert out.shape == (B, C, 1, 1), out.shape
    assert jnp.allclose(out, ref, atol=1e-5, rtol=1e-5), "f32 mismatch"

    # 2) bf16 activation on the wire (kernel casts to f32 after load).
    x_bf16 = x.astype(jnp.bfloat16)
    out_bf = jax.block_until_ready(
        cab_forward(x_bf16, w1, w2, prelu_a, gn1_g, gn1_b, gn2_g, gn2_b))
    ref_bf = cab_reference(x_bf16.astype(jnp.float32),
                           w1, w2, prelu_a, gn1_g, gn1_b, gn2_g, gn2_b)
    assert jnp.allclose(out_bf, ref_bf, atol=1e-4, rtol=1e-4), "bf16 mismatch"

    # 3) Forced HW tiling with a ragged last tile (exercises the reduction
    #    grid axis + the masked last-tile path used for large images / v7x
    #    VMEM safety).
    H2, W2 = 20, 20                                  # HW = 400, tiles of 128
    x2 = jax.random.normal(k_x2, (B, C, H2, W2), dtype=jnp.float32)
    out2 = jax.block_until_ready(
        cab_forward(x2, w1, w2, prelu_a, gn1_g, gn1_b, gn2_g, gn2_b,
                    hw_tile=128))
    ref2 = cab_reference(x2, w1, w2, prelu_a, gn1_g, gn1_b, gn2_g, gn2_b)
    assert jnp.allclose(out2, ref2, atol=1e-5, rtol=1e-5), "tiled-HW mismatch"

    print("KERNEL_OK")
</pallas_src>

<mosaic_0001>
module attributes {stable_mosaic.version = 11 : i64} {
  func.func @_cab_kernel(%arg0: i32, %arg1: i32, %arg2: memref<2x16x256xf32, #tpu.memory_space<vmem>>, %arg3: memref<16x4xf32, #tpu.memory_space<vmem>>, %arg4: memref<4x16xf32, #tpu.memory_space<vmem>>, %arg5: memref<3x4xf32, #tpu.memory_space<vmem>>, %arg6: memref<2x16xf32, #tpu.memory_space<vmem>>, %arg7: memref<2x16xf32, #tpu.memory_space<vmem>>, %arg8: memref<2x16xf32, #tpu.memory_space<vmem>>, %arg9: memref<2x16xf32, #tpu.memory_space<vmem>>) attributes {dimension_semantics = [#tpu.dimension_semantics<parallel>, #tpu.dimension_semantics<arbitrary>], iteration_bounds = array<i64: 1, 1>, scalar_prefetch = 0 : i64, scratch_operands = 2 : i64, tpu.core_type = #tpu.core_type<tc>, window_params = [{transform_indices = @transform_0, window_bounds = array<i64: 2, 16, 256>}, {pipeline_mode = #tpu.pipeline_mode<synchronous>, transform_indices = @transform_1, window_bounds = array<i64: 16, 4>}, {pipeline_mode = #tpu.pipeline_mode<synchronous>, transform_indices = @transform_2, window_bounds = array<i64: 4, 16>}, {pipeline_mode = #tpu.pipeline_mode<synchronous>, transform_indices = @transform_3, window_bounds = array<i64: 3, 4>}, {pipeline_mode = #tpu.pipeline_mode<synchronous>, transform_indices = @transform_4, window_bounds = array<i64: 2, 16>}, {transform_indices = @transform_5, window_bounds = array<i64: 2, 16>}]} {
    %c0_i32 = arith.constant 0 : i32
    %0 = arith.cmpi eq, %arg1, %c0_i32 : i32
    %1 = arith.extui %0 : i1 to i32
    %c0_i32_0 = arith.constant 0 : i32
    %2 = arith.cmpi ne, %1, %c0_i32_0 : i32
    scf.if %2 {
      %cst_14 = arith.constant 0.000000e+00 : f32
      %15 = vector.broadcast %cst_14 : f32 to vector<2x16xf32>
      %c0_15 = arith.constant 0 : index
      %c0_16 = arith.constant 0 : index
      %16 = vector.load %arg8[%c0_15, %c0_16] : memref<2x16xf32, #tpu.memory_space<vmem>>, vector<2x16xf32>
      tpu.vector_store %arg8[%c0_15, %c0_16], %15 {strides = array<i32>} : memref<2x16xf32, #tpu.memory_space<vmem>>, vector<2x16xf32>,
      %cst_17 = arith.constant 0xFF800000 : f32
      %17 = vector.broadcast %cst_17 : f32 to vector<2x16xf32>
      %c0_18 = arith.constant 0 : index
      %c0_19 = arith.constant 0 : index
      %18 = vector.load %arg9[%c0_18, %c0_19] : memref<2x16xf32, #tpu.memory_space<vmem>>, vector<2x16xf32>
      tpu.vector_store %arg9[%c0_18, %c0_19], %17 {strides = array<i32>} : memref<2x16xf32, #tpu.memory_space<vmem>>, vector<2x16xf32>,
    } else {
    }
    %c0 = arith.constant 0 : index
    %c0_1 = arith.constant 0 : index
    %c0_2 = arith.constant 0 : index
    %3 = vector.load %arg2[%c0, %c0_1, %c0_2] : memref<2x16x256xf32, #tpu.memory_space<vmem>>, vector<2x16x256xf32>
    %c0_3 = arith.constant 0 : index
    %c0_4 = arith.constant 0 : index
    %4 = vector.load %arg8[%c0_3, %c0_4] : memref<2x16xf32, #tpu.memory_space<vmem>>, vector<2x16xf32>
    %cst = arith.constant dense<0.000000e+00> : vector<2x16xf32>
    %5 = vector.multi_reduction <add>, %3, %cst [2] : vector<2x16x256xf32> to vector<2x16xf32>
    %6 = arith.addf %4, %5 : vector<2x16xf32>
    %c0_5 = arith.constant 0 : index
    %c0_6 = arith.constant 0 : index
    %7 = vector.load %arg8[%c0_5, %c0_6] : memref<2x16xf32, #tpu.memory_space<vmem>>, vector<2x16xf32>
    tpu.vector_store %arg8[%c0_5, %c0_6], %6 {strides = array<i32>} : memref<2x16xf32, #tpu.memory_space<vmem>>, vector<2x16xf32>,
    %c0_7 = arith.constant 0 : index
    %c0_8 = arith.constant 0 : index
    %8 = vector.load %arg9[%c0_7, %c0_8] : memref<2x16xf32, #tpu.memory_space<vmem>>, vector<2x16xf32>
    %cst_9 = arith.constant dense<0xFF800000> : vector<2x16xf32>
    %9 = vector.multi_reduction <maximumf>, %3, %cst_9 [2] : vector<2x16x256xf32> to vector<2x16xf32>
    %10 = arith.maximumf %8, %9 : vector<2x16xf32>
    %c0_10 = arith.constant 0 : index
    %c0_11 = arith.constant 0 : index
    %11 = vector.load %arg9[%c0_10, %c0_11] : memref<2x16xf32, #tpu.memory_space<vmem>>, vector<2x16xf32>
    tpu.vector_store %arg9[%c0_10, %c0_11], %10 {strides = array<i32>} : memref<2x16xf32, #tpu.memory_space<vmem>>, vector<2x16xf32>,
    %c0_i32_12 = arith.constant 0 : i32
    %12 = arith.cmpi eq, %arg1, %c0_i32_12 : i32
    %13 = arith.extui %12 : i1 to i32
    %c0_i32_13 = arith.constant 0 : i32
    %14 = arith.cmpi ne, %13, %c0_i32_13 : i32
    scf.if %14 {
      %c0_14 = arith.constant 0 : index
      %c0_15 = arith.constant 0 : index
      %15 = vector.load %arg8[%c0_14, %c0_15] : memref<2x16xf32, #tpu.memory_space<vmem>>, vector<2x16xf32>
      %cst_16 = arith.constant 3.906250e-03 : f32
      %16 = vector.broadcast %cst_16 : f32 to vector<2x16xf32>
      %17 = arith.mulf %15, %16 : vector<2x16xf32>
      %c0_17 = arith.constant 0 : index
      %c0_18 = arith.constant 0 : index
      %18 = vector.load %arg9[%c0_17, %c0_18] : memref<2x16xf32, #tpu.memory_space<vmem>>, vector<2x16xf32>
      %19 = tpu.concatenate %17, %18 in 0 : vector<2x16xf32>, vector<2x16xf32> -> vector<4x16xf32>
      %c0_19 = arith.constant 0 : index
      %c0_20 = arith.constant 0 : index
      %20 = vector.load %arg3[%c0_19, %c0_20] : memref<16x4xf32, #tpu.memory_space<vmem>>, vector<16x4xf32>
      %c0_21 = arith.constant 0 : index
      %c0_22 = arith.constant 0 : index
      %21 = vector.load %arg4[%c0_21, %c0_22] : memref<4x16xf32, #tpu.memory_space<vmem>>, vector<4x16xf32>
      %c0_23 = arith.constant 0 : index
      %c0_24 = arith.constant 0 : index
      %22 = vector.load %arg5[%c0_23, %c0_24] : memref<3x4xf32, #tpu.memory_space<vmem>>, vector<3x4xf32>
      %c0_25 = arith.constant 0 : index
      %c0_26 = arith.constant 0 : index
      %23 = vector.load %arg6[%c0_25, %c0_26] : memref<2x16xf32, #tpu.memory_space<vmem>>, vector<2x16xf32>
      %cst_27 = arith.constant dense<0.000000e+00> : vector<4x4xf32>
      %24 = tpu.matmul %19, %20, %cst_27 {dimension_numbers = #tpu.dot_dimension_numbers<[1], [0], [0], [1], [0, 0, 1, 1], [], []>} : vector<4x16xf32>, vector<16x4xf32>, vector<4x4xf32> -> vector<4x4xf32>
      %cst_28 = arith.constant dense<0.000000e+00> : vector<4xf32>
      %25 = vector.multi_reduction <add>, %24, %cst_28 [1] : vector<4x4xf32> to vector<4xf32>
      %26 = vector.shape_cast %25 : vector<4xf32> to vector<4x1xf32>
      %cst_29 = arith.constant 4.000000e+00 : f32
      %27 = vector.broadcast %cst_29 : f32 to vector<4x1xf32>
      %28 = arith.divf %26, %27 : vector<4x1xf32>
      %29 = vector.broadcast %28 : vector<4x1xf32> to vector<4x4xf32>
      %30 = arith.subf %24, %29 : vector<4x4xf32>
      %31 = vector.broadcast %28 : vector<4x1xf32> to vector<4x4xf32>
      %32 = arith.subf %24, %31 : vector<4x4xf32>
      %33 = arith.mulf %30, %32 : vector<4x4xf32>
      %cst_30 = arith.constant dense<0.000000e+00> : vector<4xf32>
      %34 = vector.multi_reduction <add>, %33, %cst_30 [1] : vector<4x4xf32> to vector<4xf32>
      %35 = vector.shape_cast %34 : vector<4xf32> to vector<4x1xf32>
      %cst_31 = arith.constant 4.000000e+00 : f32
      %36 = vector.broadcast %cst_31 : f32 to vector<4x1xf32>
      %37 = arith.divf %35, %36 : vector<4x1xf32>
      %38 = vector.broadcast %28 : vector<4x1xf32> to vector<4x4xf32>
      %39 = arith.subf %24, %38 : vector<4x4xf32>
      %cst_32 = arith.constant 9.99999974E-6 : f32
      %40 = vector.broadcast %cst_32 : f32 to vector<4x1xf32>
      %41 = arith.addf %37, %40 : vector<4x1xf32>
      %42 = math.rsqrt %41 : vector<4x1xf32>
      %43 = vector.broadcast %42 : vector<4x1xf32> to vector<4x4xf32>
      %44 = arith.mulf %39, %43 : vector<4x4xf32>
      %45 = vector.extract_strided_slice %22 {offsets = [1, 0], sizes = [1, 4], strides = [1, 1]} : vector<3x4xf32> to vector<1x4xf32>
      %46 = vector.broadcast %45 : vector<1x4xf32> to vector<4x4xf32>
      %47 = arith.mulf %44, %46 : vector<4x4xf32>
      %48 = vector.extract_strided_slice %22 {offsets = [2, 0], sizes = [1, 4], strides = [1, 1]} : vector<3x4xf32> to vector<1x4xf32>
      %49 = vector.broadcast %48 : vector<1x4xf32> to vector<4x4xf32>
      %50 = arith.addf %47, %49 : vector<4x4xf32>
      %cst_33 = arith.constant 0.000000e+00 : f32
      %51 = vector.broadcast %cst_33 : f32 to vector<4x4xf32>
      %52 = arith.cmpf oge, %50, %51 : vector<4x4xf32>
      %53 = vector.extract_strided_slice %22 {offsets = [0, 0], sizes = [1, 4], strides = [1, 1]} : vector<3x4xf32> to vector<1x4xf32>
      %54 = vector.broadcast %53 : vector<1x4xf32> to vector<4x4xf32>
      %55 = arith.mulf %54, %50 : vector<4x4xf32>
      %56 = arith.select %52, %50, %55 : vector<4x4xi1>, vector<4x4xf32>
      %cst_34 = arith.constant dense<0.000000e+00> : vector<4x16xf32>
      %57 = tpu.matmul %56, %21, %cst_34 {dimension_numbers = #tpu.dot_dimension_numbers<[1], [0], [0], [1], [0, 0, 1, 1], [], []>} : vector<4x4xf32>, vector<4x16xf32>, vector<4x16xf32> -> vector<4x16xf32>
      %cst_35 = arith.constant dense<0.000000e+00> : vector<4xf32>
      %58 = vector.multi_reduction <add>, %57, %cst_35 [1] : vector<4x16xf32> to vector<4xf32>
      %59 = vector.shape_cast %58 : vector<4xf32> to vector<4x1xf32>
      %cst_36 = arith.constant 1.600000e+01 : f32
      %60 = vector.broadcast %cst_36 : f32 to vector<4x1xf32>
      %61 = arith.divf %59, %60 : vector<4x1xf32>
      %62 = vector.broadcast %61 : vector<4x1xf32> to vector<4x16xf32>
      %63 = arith.subf %57, %62 : vector<4x16xf32>
      %64 = vector.broadcast %61 : vector<4x1xf32> to vector<4x16xf32>
      %65 = arith.subf %57, %64 : vector<4x16xf32>
      %66 = arith.mulf %63, %65 : vector<4x16xf32>
      %cst_37 = arith.constant dense<0.000000e+00> : vector<4xf32>
      %67 = vector.multi_reduction <add>, %66, %cst_37 [1] : vector<4x16xf32> to vector<4xf32>
      %68 = vector.shape_cast %67 : vector<4xf32> to vector<4x1xf32>
      %cst_38 = arith.constant 1.600000e+01 : f32
      %69 = vector.broadcast %cst_38 : f32 to vector<4x1xf32>
      %70 = arith.divf %68, %69 : vector<4x1xf32>
      %71 = vector.broadcast %61 : vector<4x1xf32> to vector<4x16xf32>
      %72 = arith.subf %57, %71 : vector<4x16xf32>
      %cst_39 = arith.constant 9.99999974E-6 : f32
      %73 = vector.broadcast %cst_39 : f32 to vector<4x1xf32>
      %74 = arith.addf %70, %73 : vector<4x1xf32>
      %75 = math.rsqrt %74 : vector<4x1xf32>
      %76 = vector.broadcast %75 : vector<4x1xf32> to vector<4x16xf32>
      %77 = arith.mulf %72, %76 : vector<4x16xf32>
      %78 = vector.extract_strided_slice %23 {offsets = [0, 0], sizes = [1, 16], strides = [1, 1]} : vector<2x16xf32> to vector<1x16xf32>
      %79 = vector.broadcast %78 : vector<1x16xf32> to vector<4x16xf32>
      %80 = arith.mulf %77, %79 : vector<4x16xf32>
      %81 = vector.extract_strided_slice %23 {offsets = [1, 0], sizes = [1, 16], strides = [1, 1]} : vector<2x16xf32> to vector<1x16xf32>
      %82 = vector.broadcast %81 : vector<1x16xf32> to vector<4x16xf32>
      %83 = arith.addf %80, %82 : vector<4x16xf32>
      %84 = vector.extract_strided_slice %83 {offsets = [0, 0], sizes = [2, 16], strides = [1, 1]} : vector<4x16xf32> to vector<2x16xf32>
      %85 = vector.extract_strided_slice %83 {offsets = [2, 0], sizes = [2, 16], strides = [1, 1]} : vector<4x16xf32> to vector<2x16xf32>
      %86 = arith.addf %84, %85 : vector<2x16xf32>
      %87 = arith.negf %86 : vector<2x16xf32>
      %88 = math.exp %87 : vector<2x16xf32>
      %cst_40 = arith.constant 1.000000e+00 : f32
      %89 = vector.broadcast %cst_40 : f32 to vector<2x16xf32>
      %90 = arith.addf %89, %88 : vector<2x16xf32>
      %91 = arith.divf %89, %90 : vector<2x16xf32>
      %c0_41 = arith.constant 0 : index
      %c0_42 = arith.constant 0 : index
      %92 = vector.load %arg7[%c0_41, %c0_42] : memref<2x16xf32, #tpu.memory_space<vmem>>, vector<2x16xf32>
      tpu.vector_store %arg7[%c0_41, %c0_42], %91 {strides = array<i32>} : memref<2x16xf32, #tpu.memory_space<vmem>>, vector<2x16xf32>,
    } else {
    }
    return
  }
  func.func @transform_0(%arg0: i32, %arg1: i32) -> (i32, i32, i32) {
    %c0_i32 = arith.constant 0 : i32
    %c0_i32_0 = arith.constant 0 : i32
    return %arg0, %c0_i32, %arg1 : i32, i32, i32
  }
  func.func @transform_1(%arg0: i32, %arg1: i32) -> (i32, i32) {
    %c0_i32 = arith.constant 0 : i32
    %c0_i32_0 = arith.constant 0 : i32
    %c0_i32_1 = arith.constant 0 : i32
    return %c0_i32, %c0_i32_0 : i32, i32
  }
  func.func @transform_2(%arg0: i32, %arg1: i32) -> (i32, i32) {
    %c0_i32 = arith.constant 0 : i32
    %c0_i32_0 = arith.constant 0 : i32
    %c0_i32_1 = arith.constant 0 : i32
    return %c0_i32, %c0_i32_0 : i32, i32
  }
  func.func @transform_3(%arg0: i32, %arg1: i32) -> (i32, i32) {
    %c0_i32 = arith.constant 0 : i32
    %c0_i32_0 = arith.constant 0 : i32
    %c0_i32_1 = arith.constant 0 : i32
    return %c0_i32, %c0_i32_0 : i32, i32
  }
  func.func @transform_4(%arg0: i32, %arg1: i32) -> (i32, i32) {
    %c0_i32 = arith.constant 0 : i32
    %c0_i32_0 = arith.constant 0 : i32
    %c0_i32_1 = arith.constant 0 : i32
    return %c0_i32, %c0_i32_0 : i32, i32
  }
  func.func @transform_5(%arg0: i32, %arg1: i32) -> (i32, i32) {
    %c0_i32 = arith.constant 0 : i32
    %c0_i32_0 = arith.constant 0 : i32
    return %arg0, %c0_i32 : i32, i32
  }
}

</mosaic_0001>

<bundles_post_ra>
// kernel: cab_forward.1
= control target key start
LH: loop header
LB: loop body
LE: loop exit
PB: predicated region body
PF: predicated region fallthrough
CT: control target
= control target key end

     0   :  { %s535_s0 = inlined_call_operand.vmem [shape: f32[2,16,256], index: 0, kind: input, shape index: {}]   ;;  %s536_s1 = inlined_call_operand.vmem [shape: f32[16,4], index: 1, kind: input, shape index: {}]   ;;  %s537_s2 = inlined_call_operand.vmem [shape: f32[4,16], index: 2, kind: input, shape index: {}]   ;;  %s538_s3 = inlined_call_operand.vmem [shape: f32[3,4], index: 3, kind: input, shape index: {}]   ;;  %s539_s4 = inlined_call_operand.vmem [shape: f32[2,16], index: 4, kind: input, shape index: {}]   ;;  %s540_s5 = inlined_call_operand.hbm [shape: f32[2,16], index: 5, kind: output, shape index: {}]  }
   0x1   :  { %v32_v0 = vld [vmem:[%s535_s0 + $0x20] sm:$0xff]  ;;  %v33_v1 = vld [vmem:[%s535_s0 + $0x28] sm:$0xff]  ;;  %v34_v5 = vld [vmem:[%s535_s0 + $0x30] sm:$0xff] }
   0x2   :  { %v28_v2 = vld [vmem:[%s535_s0] sm:$0xff]  ;;  %v43_v3 = vadd.f32 %v33_v1, %v32_v0  ;;  %v29_v4 = vld [vmem:[%s535_s0 + $0x8] sm:$0xff]  ;;  %v35_v6 = vld [vmem:[%s535_s0 + $0x38] sm:$0xff] }
   0x3   :  { %v37_v7 = vadd.f32 %v29_v4, %v28_v2  ;;  %v30_v8 = vld [vmem:[%s535_s0 + $0x10] sm:$0xff]  ;;  %v31_v9 = vld [vmem:[%s535_s0 + $0x18] sm:$0xff] }
   0x4   :  { %10 = vsyncpa [#allocation5], 0  ;;  %44 = vadd.xlane.f32.xlu1 %v43_v3  ;;  %v46_v10 = vadd.f32 %v35_v6, %v34_v5  ;;  %v40_v11 = vadd.f32 %v31_v9, %v30_v8  ;;  %v85_v12 = vmax.f32 %v30_v8, %v31_v9  ;;  %v82_v13 = vmax.f32 %v28_v2, %v29_v4  ;;  %v131_v18 = vld [vmem:[%s536_s1] sm:$0xff]  ;;  %v132_v19 = vld [vmem:[%s536_s1 + $0x8] sm:$0xff]  ;;  %s435_s15 = smov [#allocation4]  }
   0x5   :  { %38 = vadd.xlane.f32.xlu0 %v37_v7  ;;  %v91_v14 = vmax.f32 %v34_v5, %v35_v6  ;;  %v88_v15 = vmax.f32 %v32_v0, %v33_v1  ;;  %vm25_vm0 = vcmask 123904   ;;  %v431_v16 = vmov 0.0   ;;  %v133_v3 = vld [vmem:[%s537_s2] sm:$0xf]  ;;  %s362_s16 = sshll.u32 %s435_s15, 4  ;;  %s363_s16 = int_to_ptr.vmem [resolvable:$true] %s362_s16 }
   0x6   :  { %26 = vst.msk [vmem:[#allocation2] sm:$0x3] %vm25_vm0, %v431_v16  ;;  %386 = vmatprep.subr.mxu1 %v431_v16  ;;  %v432_v17 = vmov -inf   ;;  %v433_v20 = vmov 0.0|0.0   ;;  %v392_v21 = vpack.c.bf16 %v132_v19, %v131_v18  ;;  %vm434_vm1 = vmmov 0   ;;  %p412_p1 = scmp.lt.s32.totalorder %s363_s16, %s363_s16 }
   0x7   :  { %27 = vst.msk [vmem:[#allocation3] sm:$0x3] %vm25_vm0, %v432_v17  ;;  %391 = vmatprep.subr.bf16.mxu0 %v433_v20  ;;  %383 = vmatprep.mubr.msk.f32.mxu0 %vm434_vm1, %v431_v16  ;;  %v53_v22 = vlaneseq  ;;  %vm64_vm2 = vcmask 130112   ;;  %vm75_vm3 = vcmask 1041409   ;;  %vm129_vm4 = vcmask 1041408  }
   0x8   :  { %47 = vadd.xlane.f32.xlu1 %v46_v10  ;;  %388 = vmatprep.mubr.msk.f32.mxu1 %vm434_vm1, %v431_v16  ;;  %vm136_vm5 = vcmask 130048   ;;  %vm210_vm6 = vcmask 27648   ;;  %vm246_vm7 = vcmask 1043456   ;;  %v134_v8 = vld [vmem:[%s538_s3] sm:$0x7]  ;;  %vm242_vm9 = vcmask 31744  }
   0x9   :  { %41 = vadd.xlane.f32.xlu0 %v40_v11  ;;  %393 = vmatpush3.bf16.msra.mxu0 %v392_v21  ;;  %v54_v23 = vand.u32 127, %v53_v22  ;;  %v498_v24 = vshrl.u32 %v53_v22, 7  ;;  %vm320_vm10 = vcmask 125952  }
   0xa   :  { %387 = vmatpush3.msk.msra.mxu1 %vm246_vm7, %v133_v3 }
   0xb   :  { %v59_v25 = vadd.s32 4294967288, %v54_v23  ;;  %v57_v27 = vsub.s32 %v54_v23, %v498_v24  ;;  %v227_v7 = vsub.s32 1, %v498_v24  ;;  %v232_v9 = vsub.s32 2, %v498_v24 }
   0xc   :  { %86 = vmax.xlane.f32.xlu1 %v85_v12  ;;  %v238_v11 = vsub.s32 0, %v498_v24 }
   0xd   :  { %83 = vmax.xlane.f32.xlu0 %v82_v13  ;;  %v62_v29 = vsub.s32 %v59_v25, %v498_v24  ;;  %v36_v37 = vld [vmem:[#allocation2] sm:$0x3]  ;;  %v228_v10 = vrot.slane %v134_v8, %v227_v7 }
   0xe   :  { %v81_v49 = vld [vmem:[#allocation3] sm:$0x3]  ;;  %v239_v16 = vrot.slane %v134_v8, %v238_v11 }
  0x10   :  { %92 = vmax.xlane.f32.xlu1 %v91_v14  ;;  %v233_v14 = vrot.slane %v134_v8, %v232_v9 }
  0x11   :  { %89 = vmax.xlane.f32.xlu0 %v88_v15 }
  0x91   :  { %v45_v26 = vpop.xlane.xlu1 %44 }
  0x92   :  { %v39_v28 = vpop.xlane.xlu0 %38  ;;  %v69_v31 = vrot.slane %v45_v26, %v57_v27 }
  0x93   :  { %v58_v34 = vrot.slane %v39_v28, %v57_v27 }
  0x95   :  { %v48_v30 = vpop.xlane.xlu1 %47 }
  0x96   :  { %v73_v32 = vrot.slane %v48_v30, %v62_v29  ;;  %v42_v33 = vpop.xlane.xlu0 %41 }
  0x97   :  { %v63_v35 = vrot.slane %v42_v33, %v62_v29 }
  0x98   :  { %v74_v36 = vsel %vm64_vm2, %v73_v32, %v69_v31  ;;  %v135_v31 = vld [vmem:[%s539_s4] sm:$0x3]  ;;  %s407_s4 = scalar_lea.vmem %s363_s16, 32 }
  0x99   :  { %v65_v38 = vsel %vm64_vm2, %v63_v35, %v58_v34  ;;  %v87_v39 = vpop.xlane.xlu1 %86  ;;  %v338_v32 = vrot.slane %v135_v31, %v238_v11  ;;  %v343_v34 = vrot.slane %v135_v31, %v227_v7  ;;  %p408_p0 = scmp.ne.s32.totalorder %s363_s16, %s407_s4  ;;  %p413_p2 = scmp.lt.s32.totalorder %s407_s4, %s407_s4 }
  0x9a   :  { %v76_v40 = vsel %vm75_vm3, %v74_v36, %v65_v38  ;;  %v84_v41 = vpop.xlane.xlu0 %83  ;;  %v105_v43 = vrot.slane %v87_v39, %v62_v29 }
  0x9b   :  { %v78_v42 = vadd.f32 %v76_v40, %v36_v37  ;;  %v101_v44 = vrot.slane %v84_v41, %v57_v27  ;;  %p414_p3 = por %p413_p2, %p412_p1 }
  0x9d   :  { %v93_v45 = vpop.xlane.xlu1 %92  ;;  %80 = vst.msk [vmem:[#allocation2] sm:$0x3] %vm25_vm0, %v78_v42  ;;  %v106_v50 = vsel %vm64_vm2, %v105_v43, %v101_v44  ;;  %p415_p4 = pnand %p414_p3, %p408_p0 }
  0x9e   :  { %v114_v46 = vrot.slane %v93_v45, %v62_v29  ;;  %v90_v47 = vpop.xlane.xlu0 %89 }
  0x9f   :  { %v110_v48 = vrot.slane %v90_v47, %v57_v27 }
  0xa1   :  { %v115_v51 = vsel %vm64_vm2, %v114_v46, %v110_v48 }
  0xa2   :  { %v116_v52 = vsel %vm75_vm3, %v115_v51, %v106_v50 }
  0xa3   :  { %v118_v53 = vmax.f32 %v81_v49, %v116_v52 }
  0xa4   :  { %v123_v54 = vld [vmem:[#allocation2] sm:$0x3] }
  0xa5   :  { %119 = vst.msk [vmem:[#allocation3] sm:$0x3] %vm25_vm0, %v118_v53  ;;  %v124_v56 = vmul.f32 0.00390625, %v123_v54 }
  0xac   :  { %v125_v55 = vld [vmem:[#allocation3] sm:$0x3] }
  0xad   :  { %v127_v57 = vrot.slane %v125_v55, 6 }
  0xaf   :  { %v130_v58 = vsel %vm129_vm4, %v124_v56, %v127_v57 }
  0xb0   :  { %384 = vmatmul.mubr.msk.f32.vlgmr.msra.gmra.mrb[0].mxu0 %vm136_vm5, %v130_v58 }
 0x183   :  { %v206_v59 = vpop.f32.mrb[0].mxu0 }
 0x184   :  { %v385_v60 = vpop.f32.mrb[1].mxu0  ;;  %v211_v61 = vsel %vm210_vm6, %v206_v59, 0.0 }
 0x185   :  { %212 = vadd.xlane.f32.xlu0 %v211_v61 }
 0x212   :  { %v213_v62 = vpop.xlane.xlu0 %212 }
 0x213   :  { %v215_v63 = vmul.f32 0.25, %v213_v62 }
 0x215   :  { %v216_v0 = vsub.f32 %v206_v59, %v215_v63 }
 0x217   :  { %v217_v1 = vmul.f32 %v216_v0, %v216_v0 }
 0x219   :  { %v218_v2 = vsel %vm210_vm6, %v217_v1, 0.0 }
 0x21a   :  { %219 = vadd.xlane.f32.xlu1 %v218_v2 }
 0x2a7   :  { %v220_v4 = vpop.xlane.xlu1 %219 }
 0x2a8   :  { %v221_v5 = vmul.f32 0.25, %v220_v4 }
 0x2aa   :  { %v222_v6 = vadd.f32 1e-05, %v221_v5 }
 0x2ac   :  { %399 = vrsqrt.f32 %v222_v6 }
 0x2b6   :  { %v400_v12 = vpop.eup %399 }
 0x2b7   :  { %v224_v13 = vmul.f32 %v400_v12, %v216_v0 }
 0x2b9   :  { %v229_v15 = vmul.f32 %v228_v10, %v224_v13 }
 0x2bb   :  { %v234_v17 = vadd.f32 %v233_v14, %v229_v15 }
 0x2bd   :  { %vm235_vm8 = vcmp.ge.f32.partialorder %v234_v17, 0.0  ;;  %v240_v18 = vmul.f32 %v239_v16, %v234_v17 }
 0x2bf   :  { %v241_v19 = vsel %vm235_vm8, %v234_v17, %v240_v18 }
 0x2c0   :  { %389 = vmatmul.mubr.msk.f32.vlgmr.msra.gmra.mrb[0].mxu1 %vm242_vm9, %v241_v19 }
 0x393   :  { %v316_v20 = vpop.f32.mrb[0].mxu1 }
 0x394   :  { %v390_v21 = vpop.f32.mrb[1].mxu1  ;;  %v321_v22 = vsel %vm320_vm10, %v316_v20, 0.0 }
 0x395   :  { %322 = vadd.xlane.f32.xlu0 %v321_v22 }
 0x422   :  { %v323_v23 = vpop.xlane.xlu0 %322 }
 0x423   :  { %v325_v25 = vmul.f32 0.0625, %v323_v23 }
 0x425   :  { %v326_v26 = vsub.f32 %v316_v20, %v325_v25 }
 0x427   :  { %v327_v24 = vmul.f32 %v326_v26, %v326_v26 }
 0x429   :  { %v328_v27 = vsel %vm320_vm10, %v327_v24, 0.0 }
 0x42a   :  { %329 = vadd.xlane.f32.xlu1 %v328_v27 }
 0x4b7   :  { %v330_v28 = vpop.xlane.xlu1 %329 }
 0x4b8   :  { %v331_v29 = vmul.f32 0.0625, %v330_v28 }
 0x4ba   :  { %v332_v30 = vadd.f32 1e-05, %v331_v29 }
 0x4bc   :  { %401 = vrsqrt.f32 %v332_v30 }
 0x4c6   :  { %v402_v33 = vpop.eup %401 }
 0x4c7   :  { %v334_v35 = vmul.f32 %v402_v33, %v326_v26 }
 0x4c9   :  { %v339_v36 = vmul.f32 %v338_v32, %v334_v35 }
 0x4cb   :  { %v344_v37 = vadd.f32 %v343_v34, %v339_v36 }
 0x4cd   :  { %v346_v38 = vrot.slane %v344_v37, 2 }
 0x4cf   :  { %v348_v39 = vadd.f32 %v346_v38, %v344_v37 }
 0x4d1   :  { %v373_v40 = vmul.f32 -1.442695, %v348_v39 }
 0x4d3   :  { %403 = vpow2.f32 %v373_v40 }
 0x4dd   :  { %v404_v41 = vpop.eup %403 }
 0x4de   :  { %v352_v42 = vadd.f32 1.0, %v404_v41 }
 0x4e0   :  { %405 = vrcp.f32 %v352_v42 }
 0x4ea   :  { %v406_v43 = vpop.eup %405 }
 0x4eb   :  { %355 = vst.msk [vmem:[#allocation4] sm:$0x3] %vm25_vm0, %v406_v43 }
 0x4ec   :  { %418 = shalt.err (!%p415_p4)
}
 0x4ed   :  { %s419_s19 = scalar_lea.hbm %s540_s5, 32 }
 0x4ee   :  { %p420_p5 = scmp.ne.s32.totalorder %s540_s5, %s419_s19  ;;  %p423_p6 = scmp.lt.u32.totalorder %s419_s19, %s540_s5 }
 0x4f0   :  { %p425_p7 = pnand %p423_p6, %p420_p5 }
 0x4f2   :  { %428 = shalt.err (!%p425_p7)
}
 0x4f3   :  { %365 = dma.vmem_to_hbm [thread:$0]  %s363_s16, 32, %s540_s5, [#allocation5]  }
 0x4f4   :  { %429 = dma.done.wait [#allocation5], 32  }
 0x4f5   :  { %430 = vsyncadd [#allocation5], 4294967264 }
 0x4f6   :  { %369 = vsyncpa [#allocation5], 1 }

</bundles_post_ra>
